<compile_context>
chip_gen: v7x
topology: tpu7x:2x2x1
jax: 0.10.0
libtpu: 0.0.40
codegen_flags: <defaults>
</compile_context>

<pallas_src>
import functools

import jax
import jax.numpy as jnp
from jax.experimental import pallas as pl
from jax.experimental.pallas import tpu as pltpu

LANE = 128                      # TPU lane width
DIMS = [(21, 17), (17, 13), (13, 9), (9, 5)]
IN_PAD = 24                     # 21 -> 24 (sublane-aligned K for layer 1)
W_ROWS = IN_PAD + 3 * LANE      # packed weight slab rows: 24 + 3*128 = 408
OUT_DIM = DIMS[-1][1]           # 5
NEG_FILL = -1e30                # padded layer-4 logits -> exp() == 0 exactly


def mlp_kernel(x_ref, w_ref, b_ref, o_ref):
    # x_ref: (TB, 24)   w_ref: (408, 128)   b_ref: (8, 128)   o_ref: (TB, 128)
    x = x_ref[...]

    w1 = w_ref[0:IN_PAD, :]                         # (24, 128), real (21, 17)
    w2 = w_ref[IN_PAD:IN_PAD + LANE, :]             # (128, 128), real (17, 13)
    w3 = w_ref[IN_PAD + LANE:IN_PAD + 2 * LANE, :]  # (128, 128), real (13, 9)
    w4 = w_ref[IN_PAD + 2 * LANE:W_ROWS, :]         # (128, 128), real (9, 5)

    h = jnp.dot(x, w1, preferred_element_type=jnp.float32) + b_ref[0:1, :]
    h = jnp.maximum(h, 0.0)
    h = jnp.dot(h, w2, preferred_element_type=jnp.float32) + b_ref[1:2, :]
    h = jnp.maximum(h, 0.0)
    h = jnp.dot(h, w3, preferred_element_type=jnp.float32) + b_ref[2:3, :]
    h = jnp.maximum(h, 0.0)

    # Layer 4: bias columns 5..127 hold -1e30, so those logits vanish in softmax
    # and the full 128-wide store stays lane-dense with zeros in the pad columns.
    logits = jnp.dot(h, w4, preferred_element_type=jnp.float32) + b_ref[3:4, :]

    m = jnp.max(logits, axis=-1, keepdims=True)
    e = jnp.exp(logits - m)
    denom = jnp.sum(e, axis=-1, keepdims=True)
    o_ref[...] = e * pl.reciprocal(denom, approx=False)


def pack_params(params):
    """Pack weights into a (408, 128) slab and biases into an (8, 128) slab."""
    (w1, b1), (w2, b2), (w3, b3), (w4, b4) = params

    def pad_w(w, rows):
        out = jnp.zeros((rows, LANE), jnp.float32)
        return out.at[: w.shape[0], : w.shape[1]].set(w)

    w_slab = jnp.concatenate(
        [pad_w(w1, IN_PAD), pad_w(w2, LANE), pad_w(w3, LANE), pad_w(w4, LANE)],
        axis=0,
    )  # (408, 128)

    def pad_b(b, fill):
        row = jnp.full((LANE,), fill, jnp.float32)
        return row.at[: b.shape[0]].set(b)

    b_slab = jnp.stack(
        [
            pad_b(b1, 0.0),
            pad_b(b2, 0.0),
            pad_b(b3, 0.0),
            pad_b(b4, NEG_FILL),          # pad columns get -1e30 logits
            jnp.zeros((LANE,), jnp.float32),
            jnp.zeros((LANE,), jnp.float32),
            jnp.zeros((LANE,), jnp.float32),
            jnp.zeros((LANE,), jnp.float32),
        ],
        axis=0,
    )  # (8, 128)
    return w_slab, b_slab


@functools.partial(jax.jit, static_argnames=("block_b",))
def mlp_forward(x, w_slab, b_slab, block_b=128):
    B = x.shape[0]
    grid_b = pl.cdiv(B, block_b)
    bp = grid_b * block_b

    # Zero-pad batch to a multiple of the tile and features 21 -> 24.
    xp = jnp.zeros((bp, IN_PAD), jnp.float32).at[:B, : DIMS[0][0]].set(x)

    y = pl.pallas_call(
        mlp_kernel,
        out_shape=jax.ShapeDtypeStruct((bp, LANE), jnp.float32),
        grid=(grid_b,),
        in_specs=[
            pl.BlockSpec((block_b, IN_PAD), lambda i: (i, 0)),   # x tile
            pl.BlockSpec((W_ROWS, LANE), lambda i: (0, 0)),      # weights, resident
            pl.BlockSpec((8, LANE), lambda i: (0, 0)),           # biases, resident
        ],
        out_specs=pl.BlockSpec((block_b, LANE), lambda i: (i, 0)),
        compiler_params=pltpu.CompilerParams(
            dimension_semantics=("parallel",),
        ),
    )(xp, w_slab, b_slab)

    return y[:B, :OUT_DIM]


def init_linear(key, in_dim, out_dim):
    # PyTorch nn.Linear default init: U(-1/sqrt(in), 1/sqrt(in)) for W and b.
    kw, kb = jax.random.split(key)
    bound = 1.0 / (in_dim ** 0.5)
    w = jax.random.uniform(kw, (in_dim, out_dim), jnp.float32, -bound, bound)
    b = jax.random.uniform(kb, (out_dim,), jnp.float32, -bound, bound)
    return w, b


if __name__ == "__main__":
    key = jax.random.PRNGKey(0)
    k_x, k1, k2, k3, k4 = jax.random.split(key, 5)

    params = [init_linear(k, i, o) for k, (i, o) in zip((k1, k2, k3, k4), DIMS)]
    w_slab, b_slab = pack_params(params)

    B = 512                      # exercises the batch grid (4 tiles of 128)
    x = jax.random.normal(k_x, (B, DIMS[0][0]), jnp.float32)

    y = mlp_forward(x, w_slab, b_slab)
    y = jax.block_until_ready(y)

    assert y.shape == (B, OUT_DIM)
    assert jnp.allclose(jnp.sum(y, axis=-1), 1.0, atol=1e-5)

    # Cross-check against a pure-JAX reference on the original (unpacked) params.
    def ref(x, params):
        h = x
        for i, (w, b) in enumerate(params):
            h = h @ w + b
            if i < 3:
                h = jnp.maximum(h, 0.0)
        h = h - jnp.max(h, axis=-1, keepdims=True)
        e = jnp.exp(h)
        return e / jnp.sum(e, axis=-1, keepdims=True)

    y_ref = ref(x, params)
    assert jnp.allclose(y, y_ref, atol=1e-5, rtol=1e-5)

    print("KERNEL_OK")
</pallas_src>

<mosaic_0001>
module attributes {stable_mosaic.version = 11 : i64} {
  func.func @mlp_kernel(%arg0: i32, %arg1: memref<128x24xf32, #tpu.memory_space<vmem>>, %arg2: memref<408x128xf32, #tpu.memory_space<vmem>>, %arg3: memref<8x128xf32, #tpu.memory_space<vmem>>, %arg4: memref<128x128xf32, #tpu.memory_space<vmem>>) attributes {dimension_semantics = [#tpu.dimension_semantics<parallel>], iteration_bounds = array<i64: 4>, scalar_prefetch = 0 : i64, scratch_operands = 0 : i64, tpu.core_type = #tpu.core_type<tc>, window_params = [{transform_indices = @transform_0, window_bounds = array<i64: 128, 24>}, {pipeline_mode = #tpu.pipeline_mode<synchronous>, transform_indices = @transform_1, window_bounds = array<i64: 408, 128>}, {pipeline_mode = #tpu.pipeline_mode<synchronous>, transform_indices = @transform_2, window_bounds = array<i64: 8, 128>}, {transform_indices = @transform_3, window_bounds = array<i64: 128, 128>}]} {
    %c0 = arith.constant 0 : index
    %c0_0 = arith.constant 0 : index
    %0 = vector.load %arg1[%c0, %c0_0] : memref<128x24xf32, #tpu.memory_space<vmem>>, vector<128x24xf32>
    %c0_1 = arith.constant 0 : index
    %c0_2 = arith.constant 0 : index
    %1 = vector.load %arg2[%c0_1, %c0_2] : memref<408x128xf32, #tpu.memory_space<vmem>>, vector<24x128xf32>
    %c24 = arith.constant 24 : index
    %c0_3 = arith.constant 0 : index
    %2 = vector.load %arg2[%c24, %c0_3] : memref<408x128xf32, #tpu.memory_space<vmem>>, vector<128x128xf32>
    %c152 = arith.constant 152 : index
    %c0_4 = arith.constant 0 : index
    %3 = vector.load %arg2[%c152, %c0_4] : memref<408x128xf32, #tpu.memory_space<vmem>>, vector<128x128xf32>
    %c280 = arith.constant 280 : index
    %c0_5 = arith.constant 0 : index
    %4 = vector.load %arg2[%c280, %c0_5] : memref<408x128xf32, #tpu.memory_space<vmem>>, vector<128x128xf32>
    %cst = arith.constant dense<0.000000e+00> : vector<128x128xf32>
    %5 = tpu.matmul %0, %1, %cst {dimension_numbers = #tpu.dot_dimension_numbers<[1], [0], [0], [1], [0, 0, 1, 1], [], []>} : vector<128x24xf32>, vector<24x128xf32>, vector<128x128xf32> -> vector<128x128xf32>
    %c0_6 = arith.constant 0 : index
    %c0_7 = arith.constant 0 : index
    %6 = vector.load %arg3[%c0_6, %c0_7] : memref<8x128xf32, #tpu.memory_space<vmem>>, vector<1x128xf32>
    %7 = vector.broadcast %6 : vector<1x128xf32> to vector<128x128xf32>
    %8 = arith.addf %5, %7 : vector<128x128xf32>
    %cst_8 = arith.constant 0.000000e+00 : f32
    %9 = vector.broadcast %cst_8 : f32 to vector<128x128xf32>
    %10 = arith.maximumf %8, %9 : vector<128x128xf32>
    %cst_9 = arith.constant dense<0.000000e+00> : vector<128x128xf32>
    %11 = tpu.matmul %10, %2, %cst_9 {dimension_numbers = #tpu.dot_dimension_numbers<[1], [0], [0], [1], [0, 0, 1, 1], [], []>} : vector<128x128xf32>, vector<128x128xf32>, vector<128x128xf32> -> vector<128x128xf32>
    %c1 = arith.constant 1 : index
    %c0_10 = arith.constant 0 : index
    %12 = vector.load %arg3[%c1, %c0_10] : memref<8x128xf32, #tpu.memory_space<vmem>>, vector<1x128xf32>
    %13 = vector.broadcast %12 : vector<1x128xf32> to vector<128x128xf32>
    %14 = arith.addf %11, %13 : vector<128x128xf32>
    %cst_11 = arith.constant 0.000000e+00 : f32
    %15 = vector.broadcast %cst_11 : f32 to vector<128x128xf32>
    %16 = arith.maximumf %14, %15 : vector<128x128xf32>
    %cst_12 = arith.constant dense<0.000000e+00> : vector<128x128xf32>
    %17 = tpu.matmul %16, %3, %cst_12 {dimension_numbers = #tpu.dot_dimension_numbers<[1], [0], [0], [1], [0, 0, 1, 1], [], []>} : vector<128x128xf32>, vector<128x128xf32>, vector<128x128xf32> -> vector<128x128xf32>
    %c2 = arith.constant 2 : index
    %c0_13 = arith.constant 0 : index
    %18 = vector.load %arg3[%c2, %c0_13] : memref<8x128xf32, #tpu.memory_space<vmem>>, vector<1x128xf32>
    %19 = vector.broadcast %18 : vector<1x128xf32> to vector<128x128xf32>
    %20 = arith.addf %17, %19 : vector<128x128xf32>
    %cst_14 = arith.constant 0.000000e+00 : f32
    %21 = vector.broadcast %cst_14 : f32 to vector<128x128xf32>
    %22 = arith.maximumf %20, %21 : vector<128x128xf32>
    %cst_15 = arith.constant dense<0.000000e+00> : vector<128x128xf32>
    %23 = tpu.matmul %22, %4, %cst_15 {dimension_numbers = #tpu.dot_dimension_numbers<[1], [0], [0], [1], [0, 0, 1, 1], [], []>} : vector<128x128xf32>, vector<128x128xf32>, vector<128x128xf32> -> vector<128x128xf32>
    %c3 = arith.constant 3 : index
    %c0_16 = arith.constant 0 : index
    %24 = vector.load %arg3[%c3, %c0_16] : memref<8x128xf32, #tpu.memory_space<vmem>>, vector<1x128xf32>
    %25 = vector.broadcast %24 : vector<1x128xf32> to vector<128x128xf32>
    %26 = arith.addf %23, %25 : vector<128x128xf32>
    %cst_17 = arith.constant dense<0xFF800000> : vector<128xf32>
    %27 = vector.multi_reduction <maximumf>, %26, %cst_17 [1] : vector<128x128xf32> to vector<128xf32>
    %28 = vector.shape_cast %27 : vector<128xf32> to vector<128x1xf32>
    %29 = vector.broadcast %28 : vector<128x1xf32> to vector<128x128xf32>
    %30 = arith.subf %26, %29 : vector<128x128xf32>
    %31 = math.exp %30 : vector<128x128xf32>
    %cst_18 = arith.constant dense<0.000000e+00> : vector<128xf32>
    %32 = vector.multi_reduction <add>, %31, %cst_18 [1] : vector<128x128xf32> to vector<128xf32>
    %33 = vector.shape_cast %32 : vector<128xf32> to vector<128x1xf32>
    %34 = tpu.reciprocal %33 : vector<128x1xf32> -> vector<128x1xf32>
    %35 = vector.broadcast %34 : vector<128x1xf32> to vector<128x128xf32>
    %36 = arith.mulf %31, %35 : vector<128x128xf32>
    %c0_19 = arith.constant 0 : index
    %c0_20 = arith.constant 0 : index
    %37 = vector.load %arg4[%c0_19, %c0_20] : memref<128x128xf32, #tpu.memory_space<vmem>>, vector<128x128xf32>
    tpu.vector_store %arg4[%c0_19, %c0_20], %36 {strides = array<i32>} : memref<128x128xf32, #tpu.memory_space<vmem>>, vector<128x128xf32>,
    return
  }
  func.func @transform_0(%arg0: i32) -> (i32, i32) {
    %c0_i32 = arith.constant 0 : i32
    %c0_i32_0 = arith.constant 0 : i32
    return %arg0, %c0_i32 : i32, i32
  }
  func.func @transform_1(%arg0: i32) -> (i32, i32) {
    %c0_i32 = arith.constant 0 : i32
    %c0_i32_0 = arith.constant 0 : i32
    %c0_i32_1 = arith.constant 0 : i32
    return %c0_i32, %c0_i32_0 : i32, i32
  }
  func.func @transform_2(%arg0: i32) -> (i32, i32) {
    %c0_i32 = arith.constant 0 : i32
    %c0_i32_0 = arith.constant 0 : i32
    %c0_i32_1 = arith.constant 0 : i32
    return %c0_i32, %c0_i32_0 : i32, i32
  }
  func.func @transform_3(%arg0: i32) -> (i32, i32) {
    %c0_i32 = arith.constant 0 : i32
    %c0_i32_0 = arith.constant 0 : i32
    return %arg0, %c0_i32 : i32, i32
  }
}

</mosaic_0001>

<bundles_post_ra>
// kernel: mlp_forward.1
= control target key start
LH: loop header
LB: loop body
LE: loop exit
PB: predicated region body
PF: predicated region fallthrough
CT: control target
= control target key end

     0   :  { %s1714_s12 = smov 0   ;;  %s2093_s0 = inlined_call_operand.vmem [shape: f32[512,24], index: 0, kind: input, shape index: {}]   ;;  %s2094_s1 = inlined_call_operand.vmem [shape: f32[408,128], index: 1, kind: input, shape index: {}]   ;;  %s2095_s2 = inlined_call_operand.vmem [shape: f32[8,128], index: 2, kind: input, shape index: {}]   ;;  %s2096_s3 = inlined_call_operand.vmem [shape: f32[512,128], index: 3, kind: output, shape index: {}]  }
   0x1 LB: > { %s1154_s13 = sadd.s32 4294967295, %s1692_s12   ;;  %p1158_p0 = scmp.ge.s32.totalorder %s1692_s12, 1  ;;  %s1692_s12 = sphi %s1714_s12, %s13_s12  }
   0x2   : > { %p138_p1 = scmp.lt.s32.totalorder %s1692_s12, 5 }
   0x4   : > { %p139_p2 = pnand %p1158_p0, %p138_p1 }
   0x5   : > { %v190_v0 = vld [vmem:[%s2094_s1] sm:$0xff] (!%p139_p2)  ;;  %v191_v1 = vld [vmem:[%s2094_s1 + $0x8] sm:$0xff] (!%p139_p2)  ;;  %s1159_s18 = sshll.u32 (!%p139_p2), %s1154_s13, 4  ;;  %v193_v3 = vld [vmem:[%s2094_s1 + $0x18] sm:$0xff] (!%p139_p2)  ;;  %vm246_vm0 = vcmask (!%p139_p2), 195584  }
   0x6   : > { %142 = sbr.rel (%p139_p2) target bundleno = 1232 (0x4d0), region = 32  ;;  %v1498_v2 = vpack.c.bf16 (!%p139_p2), %v191_v1, %v190_v0  ;;  %p163_p3 = scmp.lt.s32.totalorder (!%p139_p2), %s1159_s18, 63  ;;  %v194_v4 = vld [vmem:[%s2094_s1 + $0x20] sm:$0xff] (!%p139_p2)  ;;  %v195_v5 = vld [vmem:[%s2094_s1 + $0x28] sm:$0xff] (!%p139_p2)  ;;  %v192_v6 = vld [vmem:[%s2094_s1 + $0x10] sm:$0xff] (!%p139_p2) }
   0x7   : > { %v1502_v7 = vpack.c.bf16 (!%p139_p2), %v194_v4, %v193_v3  ;;  %v196_v8 = vld [vmem:[%s2094_s1 + $0x30] sm:$0xff] (!%p139_p2)  ;;  %v197_v10 = vld [vmem:[%s2094_s1 + $0x38] sm:$0xff] (!%p139_p2)  ;;  %v198_v11 = vld [vmem:[%s2094_s1 + $0x40] sm:$0xff] (!%p139_p2) }
   0x8   : > { %1499 = vmatprep.subr.bf16.mxu0 (!%p139_p2), %v1498_v2  ;;  %v1506_v9 = vpack.c.bf16 (!%p139_p2), %v196_v8, %v195_v5  ;;  %v1510_v12 = vpack.c.bf16 (!%p139_p2), %v198_v11, %v197_v10  ;;  %v199_v13 = vld [vmem:[%s2094_s1 + $0x48] sm:$0xff] (!%p139_p2)  ;;  %v200_v14 = vld [vmem:[%s2094_s1 + $0x50] sm:$0xff] (!%p139_p2)  ;;  %v201_v21 = vld [vmem:[%s2094_s1 + $0x58] sm:$0xff] (!%p139_p2) }
   0x9   : > { %1501 = vmatpush3.bf16.msra.mxu0 (!%p139_p2), %v1498_v2  ;;  %1503 = vmatprep.subr.bf16.mxu1 (!%p139_p2), %v1502_v7  ;;  %v1514_v19 = vpack.c.bf16 (!%p139_p2), %v200_v14, %v199_v13  ;;  %v202_v22 = vld [vmem:[%s2094_s1 + $0x60] sm:$0xff] (!%p139_p2)  ;;  %v203_v26 = vld [vmem:[%s2094_s1 + $0x68] sm:$0xff] (!%p139_p2)  ;;  %v204_v27 = vld [vmem:[%s2094_s1 + $0x70] sm:$0xff] (!%p139_p2) }
   0xa   : > { %1304 = vmatprep.subr.mxu0 (!%p139_p2), %v192_v6  ;;  %1505 = vmatpush3.bf16.msra.mxu1 (!%p139_p2), %v1502_v7  ;;  %v1518_v24 = vpack.c.bf16 (!%p139_p2), %v202_v22, %v201_v21  ;;  %v1522_v29 = vpack.c.bf16 (!%p139_p2), %v204_v27, %v203_v26  ;;  %v205_v31 = vld [vmem:[%s2094_s1 + $0x78] sm:$0xff] (!%p139_p2)  ;;  %v206_v32 = vld [vmem:[%s2094_s1 + $0x80] sm:$0xff] (!%p139_p2)  ;;  %v207_v41 = vld [vmem:[%s2094_s1 + $0x88] sm:$0xff] (!%p139_p2) }
   0xb   : > { %1507 = vmatprep.subr.bf16.mxu1 (!%p139_p2), %v1506_v9  ;;  %v1526_v34 = vpack.c.bf16 (!%p139_p2), %v206_v32, %v205_v31  ;;  %v208_v42 = vld [vmem:[%s2094_s1 + $0x90] sm:$0xff] (!%p139_p2)  ;;  %v209_v44 = vld [vmem:[%s2094_s1 + $0x98] sm:$0xff] (!%p139_p2)  ;;  %v210_v45 = vld [vmem:[%s2094_s1 + $0xa0] sm:$0xff] (!%p139_p2) }
   0xc   : > { %v1530_v43 = vpack.c.bf16 (!%p139_p2), %v208_v42, %v207_v41  ;;  %v211_v46 = vld [vmem:[%s2094_s1 + $0xa8] sm:$0xff] (!%p139_p2)  ;;  %v1534_v47 = vpack.c.bf16 (!%p139_p2), %v210_v45, %v209_v44  ;;  %v212_v48 = vld [vmem:[%s2094_s1 + $0xb0] sm:$0xff] (!%p139_p2)  ;;  %v213_v50 = vld [vmem:[%s2094_s1 + $0xb8] sm:$0xff] (!%p139_p2) }
   0xd   : > { %s2098_s18 = smov (!%p163_p3, %s1159_s18), 63  ;;  %1305 = vmatpush3.msra.mxu0 %v192_v6  ;;  %v1538_v49 = vpack.c.bf16 %v212_v48, %v211_v46  ;;  %v214_v51 = vld [vmem:[%s2094_s1 + $0xc0] sm:$0xff]  ;;  %v215_v53 = vld [vmem:[%s2094_s1 + $0xc8] sm:$0xff]  ;;  %v216_v54 = vld [vmem:[%s2094_s1 + $0xd0] sm:$0xff] }
   0xe   : > { %s1160_s6 = sshll.u32 %s2098_s18, 3  ;;  %1509 = vmatpush3.bf16.msra.mxu1 %v1506_v9  ;;  %1535 = vmatprep.subr.bf16.mxu0 %v1534_v47  ;;  %v1542_v52 = vpack.c.bf16 %v214_v51, %v213_v50  ;;  %v1546_v55 = vpack.c.bf16 %v216_v54, %v215_v53  ;;  %v217_v56 = vld [vmem:[%s2094_s1 + $0xd8] sm:$0xff]  ;;  %v218_v57 = vld [vmem:[%s2094_s1 + $0xe0] sm:$0xff]  ;;  %v219_v59 = vld [vmem:[%s2094_s1 + $0xe8] sm:$0xff] }
   0xf   : > { %s1757_s9 = scalar_lea.vmem %s2093_s0, %s1160_s6  ;;  %1511 = vmatprep.subr.bf16.mxu1 %v1510_v12  ;;  %v1550_v58 = vpack.c.bf16 %v218_v57, %v217_v56  ;;  %v220_v60 = vld [vmem:[%s2094_s1 + $0xf0] sm:$0xff]  ;;  %v221_v62 = vld [vmem:[%s2094_s1 + $0xf8] sm:$0xff]  ;;  %v222_v63 = vld [vmem:[%s2094_s1 + $0x100] sm:$0xff]  ;;  %s2056_s8 = scalar_lea.vmem %s2096_s3, %s1160_s6 }
  0x10   : > { %v174_v15 = vld [vmem:[%s1757_s9] sm:$0xff]  ;;  %v175_v16 = vld [vmem:[%s1757_s9 + $0x8] sm:$0xff]  ;;  %v176_v17 = vld [vmem:[%s1757_s9 + $0x10] sm:$0xff]  ;;  %v1554_v61 = vpack.c.bf16 %v220_v60, %v219_v59  ;;  %v1558_v0 = vpack.c.bf16 %v222_v63, %v221_v62 }
  0x11   : > { %1306 = vmatprep.mubr.msk.f32.mxu0 %vm246_vm0, %v174_v15  ;;  %v177_v18 = vld [vmem:[%s1757_s9 + $0x18] sm:$0xff]  ;;  %v178_v20 = vld [vmem:[%s1757_s9 + $0x20] sm:$0xff]  ;;  %v179_v23 = vld [vmem:[%s1757_s9 + $0x28] sm:$0xff] }
  0x12   : > { %1307 = vmatmul.mubr.msk.f32.vlgmr.msra.gmra.mrb[0].mxu0 %vm246_vm0, %v175_v16  ;;  %1513 = vmatpush3.bf16.msra.mxu1 %v1510_v12  ;;  %v180_v25 = vld [vmem:[%s1757_s9 + $0x30] sm:$0xff]  ;;  %v181_v28 = vld [vmem:[%s1757_s9 + $0x38] sm:$0xff]  ;;  %v182_v30 = vld [vmem:[%s1757_s9 + $0x40] sm:$0xff] }
  0x13   : > { %1309 = vmatprep.mubr.msk.f32.mxu0 %vm246_vm0, %v176_v17  ;;  %1515 = vmatprep.subr.bf16.mxu1 %v1514_v19  ;;  %v183_v33 = vld [vmem:[%s1757_s9 + $0x48] sm:$0xff]  ;;  %v184_v35 = vld [vmem:[%s1757_s9 + $0x50] sm:$0xff]  ;;  %v185_v36 = vld [vmem:[%s1757_s9 + $0x58] sm:$0xff] }
  0x14   : > { %v186_v37 = vld [vmem:[%s1757_s9 + $0x60] sm:$0xff]  ;;  %v187_v38 = vld [vmem:[%s1757_s9 + $0x68] sm:$0xff]  ;;  %v188_v39 = vld [vmem:[%s1757_s9 + $0x70] sm:$0xff]  ;;  %1537 = vmatpush3.bf16.msra.mxu0 %v1534_v47 }
  0x15   : > { %v189_v40 = vld [vmem:[%s1757_s9 + $0x78] sm:$0xff]  ;;  %1539 = vmatprep.subr.bf16.mxu0 %v1538_v49  ;;  %v1163_v1 = vld [vmem:[%s2095_s2] ss:$0 sm:$0xff]  ;;  %v223_v50 = vld [vmem:[%s2094_s1 + $0x108] sm:$0xff] }
  0x16   : > { %1310 = vmatmul.mubr.msk.f32.gmra.mrb[2].mxu0 %vm246_vm0, %v177_v18  ;;  %1517 = vmatpush3.bf16.msra.mxu1 %v1514_v19  ;;  %v224_v51 = vld [vmem:[%s2094_s1 + $0x110] sm:$0xff]  ;;  %v225_v53 = vld [vmem:[%s2094_s1 + $0x118] sm:$0xff]  ;;  %v226_v54 = vld [vmem:[%s2094_s1 + $0x120] sm:$0xff] }
  0x17   : > { %1312 = vmatprep.mubr.msk.f32.mxu0 %vm246_vm0, %v178_v20  ;;  %1519 = vmatprep.subr.bf16.mxu1 %v1518_v24  ;;  %v1566_v56 = vpack.c.bf16 %v226_v54, %v225_v53  ;;  %v228_v57 = vld [vmem:[%s2094_s1 + $0x130] sm:$0xff]  ;;  %v229_v59 = vld [vmem:[%s2094_s1 + $0x138] sm:$0xff]  ;;  %v230_v60 = vld [vmem:[%s2094_s1 + $0x140] sm:$0xff] }
  0x18   : > { %1541 = vmatpush3.bf16.msra.mxu0 %v1538_v49  ;;  %v231_v62 = vld [vmem:[%s2094_s1 + $0x148] sm:$0xff]  ;;  %v232_v63 = vld [vmem:[%s2094_s1 + $0x150] sm:$0xff] }
  0x19   : > { %1543 = vmatprep.subr.bf16.mxu0 %v1542_v52 }
  0x1a   : > { %1313 = vmatmul.mubr.msk.f32.gmra.mrb[4].mxu0 %vm246_vm0, %v179_v23  ;;  %1521 = vmatpush3.bf16.msra.mxu1 %v1518_v24 }
  0x1b   : > { %1315 = vmatprep.mubr.msk.f32.mxu0 %vm246_vm0, %v180_v25  ;;  %1523 = vmatprep.subr.bf16.mxu1 %v1522_v29 }
  0x1c   : > { %1545 = vmatpush3.bf16.msra.mxu0 %v1542_v52  ;;  %v1562_v52 = vpack.c.bf16 %v224_v51, %v223_v50 }
  0x1d   : > { %1547 = vmatprep.subr.bf16.mxu0 %v1546_v55 }
  0x1e   : > { %1316 = vmatmul.mubr.msk.f32.gmra.mrb[6].mxu0 %vm246_vm0, %v181_v28  ;;  %1525 = vmatpush3.bf16.msra.mxu1 %v1522_v29 }
  0x1f   : > { %1318 = vmatprep.mubr.msk.f32.mxu0 %vm246_vm0, %v182_v30  ;;  %1527 = vmatprep.subr.bf16.mxu1 %v1526_v34 }
  0x20   : > { %1549 = vmatpush3.bf16.msra.mxu0 %v1546_v55  ;;  %v227_v55 = vld [vmem:[%s2094_s1 + $0x128] sm:$0xff] }
  0x21   : > { %1551 = vmatprep.subr.bf16.mxu0 %v1550_v58 }
  0x22   : > { %1319 = vmatmul.mubr.msk.f32.gmra.mrb[8].mxu0 %vm246_vm0, %v183_v33  ;;  %1529 = vmatpush3.bf16.msra.mxu1 %v1526_v34 }
  0x23   : > { %1321 = vmatprep.mubr.msk.f32.mxu0 %vm246_vm0, %v184_v35  ;;  %1531 = vmatprep.subr.bf16.mxu1 %v1530_v43 }
  0x24   : > { %1553 = vmatpush3.bf16.msra.mxu0 %v1550_v58  ;;  %v1570_v58 = vpack.c.bf16 %v228_v57, %v227_v55 }
  0x25   : > { %1555 = vmatprep.subr.bf16.mxu0 %v1554_v61 }
  0x26   : > { %1322 = vmatmul.mubr.msk.f32.gmra.mrb[10].mxu0 %vm246_vm0, %v185_v36  ;;  %1533 = vmatpush3.bf16.msra.mxu1 %v1530_v43 }
  0x27   : > { %1324 = vmatprep.mubr.msk.f32.mxu0 %vm246_vm0, %v186_v37  ;;  %1598 = vmatprep.subr.bf16.mxu1 %v1566_v56 }
  0x28   : > { %1557 = vmatpush3.bf16.msra.mxu0 %v1554_v61  ;;  %v1574_v61 = vpack.c.bf16 %v230_v60, %v229_v59  ;;  %v239_v59 = vld [vmem:[%s2094_s1 + $0x188] sm:$0xff]  ;;  %v240_v60 = vld [vmem:[%s2094_s1 + $0x190] sm:$0xff] }
  0x29   : > { %1559 = vmatprep.subr.bf16.mxu0 %v1558_v0 }
  0x2a   : > { %1325 = vmatmul.mubr.msk.f32.gmra.mrb[12].mxu0 %vm246_vm0, %v187_v38 }
  0x2b   : > { %1327 = vmatprep.mubr.msk.f32.mxu0 %vm246_vm0, %v188_v39 }
  0x2c   : > { %1561 = vmatpush3.bf16.msra.mxu0 %v1558_v0  ;;  %v1896_v0 = vpack.c.bf16 %v232_v63, %v231_v62  ;;  %v1181_v62 = vld [vmem:[%s2095_s2 + $0x2] ss:$0 sm:$0xff] }
  0x2d   : > { %1563 = vmatprep.subr.bf16.mxu0 %v1562_v52 }
  0x2e   : > { %1328 = vmatmul.mubr.msk.f32.gmra.mrb[14].mxu0 %vm246_vm0, %v189_v40 }
  0x30   : > { %1565 = vmatpush3.bf16.msra.mxu0 %v1562_v52 }
  0x31   : > { %1567 = vmatprep.subr.bf16.mxu0 %v1566_v56 }
  0xe5   : > { %v1308_v2 = vpop.f32.mrb[0].mxu0 }
  0xe6   : > { %v367_v3 = vadd.f32 %v1308_v2, %v1163_v1  ;;  %v361_v4 = vpop.f32.mrb[1].mxu0  ;;  %v234_v2 = vld [vmem:[%s2094_s1 + $0x160] sm:$0xff] }
  0xe7   : > { %v362_v5 = vadd.f32 %v1163_v1, %v361_v4  ;;  %v235_v4 = vld [vmem:[%s2094_s1 + $0x168] sm:$0xff] }
  0xe8   : > { %v441_v8 = vmax.f32 %v367_v3, 0.0 }
  0xe9   : > { %v1311_v6 = vpop.f32.mrb[2].mxu0  ;;  %v440_v7 = vmax.f32 %v362_v5, 0.0  ;;  %v236_v5 = vld [vmem:[%s2094_s1 + $0x170] sm:$0xff] }
  0xea   : > { %v377_v9 = vadd.f32 %v1311_v6, %v1163_v1  ;;  %v371_v10 = vpop.f32.mrb[3].mxu0  ;;  %v1915_v6 = vpack.c.bf16 %v236_v5, %v235_v4 }
  0xeb   : > { %v372_v11 = vadd.f32 %v1163_v1, %v371_v10  ;;  %1362 = vmatprep.mubr.f32.mxu1 %v440_v7  ;;  %v237_v7 = vld [vmem:[%s2094_s1 + $0x178] sm:$0xff]  ;;  %v1933_v10 = vld [vmem:[%s2095_s2 + $0x1] ss:$0 sm:$0xff] }
  0xec   : > { %1363 = vmatmul.mubr.f32.vlgmr.msra.gmra.mrb[0].mxu1 %v441_v8  ;;  %v443_v14 = vmax.f32 %v377_v9, 0.0  ;;  %v238_v8 = vld [vmem:[%s2094_s1 + $0x180] sm:$0xff] }
  0xed   : > { %v442_v12 = vmax.f32 %v372_v11, 0.0  ;;  %v1314_v13 = vpop.f32.mrb[4].mxu0  ;;  %1606 = vmatpush3.bf16.msra.mxu1 %v1566_v56  ;;  %v1925_v9 = vpack.c.bf16 %v238_v8, %v237_v7 }
  0xee   : > { %v387_v15 = vadd.f32 %v1314_v13, %v1163_v1  ;;  %v381_v16 = vpop.f32.mrb[5].mxu0  ;;  %1599 = vmatprep.subr.bf16.mxu1 %v1570_v58 }
  0xef   : > { %v382_v17 = vadd.f32 %v1163_v1, %v381_v16  ;;  %1365 = vmatprep.mubr.f32.mxu1 %v442_v12 }
  0xf0   : > { %v445_v18 = vmax.f32 %v387_v15, 0.0  ;;  %1366 = vmatmul.mubr.f32.gmra.mrb[2].mxu1 %v443_v14 }
  0xf1   : > { %v444_v19 = vmax.f32 %v382_v17, 0.0  ;;  %v1317_v20 = vpop.f32.mrb[6].mxu0  ;;  %1607 = vmatpush3.bf16.msra.mxu1 %v1570_v58 }
  0xf2   : > { %v397_v21 = vadd.f32 %v1317_v20, %v1163_v1  ;;  %v391_v22 = vpop.f32.mrb[7].mxu0  ;;  %1600 = vmatprep.subr.bf16.mxu1 %v1574_v61 }
  0xf3   : > { %v392_v23 = vadd.f32 %v1163_v1, %v391_v22  ;;  %1368 = vmatprep.mubr.f32.mxu1 %v444_v19 }
  0xf4   : > { %v447_v24 = vmax.f32 %v397_v21, 0.0  ;;  %1369 = vmatmul.mubr.f32.gmra.mrb[4].mxu1 %v445_v18 }
  0xf5   : > { %v446_v25 = vmax.f32 %v392_v23, 0.0  ;;  %v1320_v26 = vpop.f32.mrb[8].mxu0  ;;  %1608 = vmatpush3.bf16.msra.mxu1 %v1574_v61 }
  0xf6   : > { %v407_v27 = vadd.f32 %v1320_v26, %v1163_v1  ;;  %v401_v28 = vpop.f32.mrb[9].mxu0  ;;  %1601 = vmatprep.subr.bf16.mxu1 %v1896_v0 }
  0xf7   : > { %v402_v29 = vadd.f32 %v1163_v1, %v401_v28  ;;  %1371 = vmatprep.mubr.f32.mxu1 %v446_v25 }
  0xf8   : > { %v449_v30 = vmax.f32 %v407_v27, 0.0  ;;  %1372 = vmatmul.mubr.f32.gmra.mrb[6].mxu1 %v447_v24 }
  0xf9   : > { %v448_v31 = vmax.f32 %v402_v29, 0.0  ;;  %v1323_v32 = vpop.f32.mrb[10].mxu0  ;;  %1609 = vmatpush3.bf16.msra.mxu1 %v1896_v0 }
  0xfa   : > { %v417_v33 = vadd.f32 %v1323_v32, %v1163_v1  ;;  %v411_v34 = vpop.f32.mrb[11].mxu0 }
  0xfb   : > { %v412_v35 = vadd.f32 %v1163_v1, %v411_v34  ;;  %1374 = vmatprep.mubr.f32.mxu1 %v448_v31 }
  0xfc   : > { %v451_v36 = vmax.f32 %v417_v33, 0.0  ;;  %1375 = vmatmul.mubr.f32.gmra.mrb[8].mxu1 %v449_v30 }
  0xfd   : > { %v450_v37 = vmax.f32 %v412_v35, 0.0  ;;  %v1326_v38 = vpop.f32.mrb[12].mxu0 }
  0xfe   : > { %v427_v39 = vadd.f32 %v1326_v38, %v1163_v1  ;;  %v421_v40 = vpop.f32.mrb[13].mxu0 }
  0xff   : > { %v422_v41 = vadd.f32 %v1163_v1, %v421_v40  ;;  %1377 = vmatprep.mubr.f32.mxu1 %v450_v37 }
 0x100   : > { %v453_v42 = vmax.f32 %v427_v39, 0.0  ;;  %1378 = vmatmul.mubr.f32.gmra.mrb[10].mxu1 %v451_v36 }
 0x101   : > { %v452_v43 = vmax.f32 %v422_v41, 0.0  ;;  %v1329_v44 = vpop.f32.mrb[14].mxu0 }
 0x102   : > { %v437_v45 = vadd.f32 %v1329_v44, %v1163_v1  ;;  %v431_v46 = vpop.f32.mrb[15].mxu0 }
 0x103   : > { %v432_v47 = vadd.f32 %v1163_v1, %v431_v46  ;;  %1380 = vmatprep.mubr.f32.mxu1 %v452_v43  ;;  %v233_v1 = vld [vmem:[%s2094_s1 + $0x158] sm:$0xff] }
 0x104   : > { %v455_v48 = vmax.f32 %v437_v45, 0.0  ;;  %1381 = vmatmul.mubr.f32.gmra.mrb[12].mxu1 %v453_v42  ;;  %v1905_v3 = vpack.c.bf16 %v234_v2, %v233_v1 }
 0x105   : > { %v454_v49 = vmax.f32 %v432_v47, 0.0 }
 0x106   : > { %1602 = vmatprep.subr.bf16.mxu1 %v1905_v3 }
 0x107   : > { %1383 = vmatprep.mubr.f32.mxu1 %v454_v49  ;;  %1610 = vmatpush3.bf16.msra.mxu1 %v1905_v3 }
 0x108   : > { %1384 = vmatmul.mubr.f32.gmra.mrb[14].mxu1 %v455_v48  ;;  %1603 = vmatprep.subr.bf16.mxu1 %v1915_v6 }
 0x10b   : > { %1611 = vmatpush3.bf16.msra.mxu1 %v1915_v6 }
 0x10c   : > { %1604 = vmatprep.subr.bf16.mxu1 %v1925_v9 }
 0x10f   : > { %1612 = vmatpush3.bf16.msra.mxu1 %v1925_v9 }
 0x1bf   : > { %v1364_v11 = vpop.f32.mrb[0].mxu1 }
 0x1c0   : > { %v533_v12 = vadd.f32 %v1364_v11, %v1933_v10  ;;  %v527_v13 = vpop.f32.mrb[1].mxu1 }
 0x1c1   : > { %v528_v14 = vadd.f32 %v1933_v10, %v527_v13 }
 0x1c2   : > { %v607_v17 = vmax.f32 %v533_v12, 0.0 }
 0x1c3   : > { %v606_v15 = vmax.f32 %v528_v14, 0.0  ;;  %v1367_v16 = vpop.f32.mrb[2].mxu1 }
 0x1c4   : > { %v543_v18 = vadd.f32 %v1367_v16, %v1933_v10  ;;  %v537_v19 = vpop.f32.mrb[3].mxu1 }
 0x1c5   : > { %v538_v20 = vadd.f32 %v1933_v10, %v537_v19  ;;  %1418 = vmatprep.mubr.f32.mxu0 %v606_v15 }
 0x1c6   : > { %1419 = vmatmul.mubr.f32.vlgmr.msra.gmra.mrb[16].mxu0 %v607_v17  ;;  %v609_v23 = vmax.f32 %v543_v18, 0.0 }
 0x1c7   : > { %v608_v21 = vmax.f32 %v538_v20, 0.0  ;;  %v1370_v22 = vpop.f32.mrb[4].mxu1  ;;  %1569 = vmatpush3.bf16.msra.mxu0 %v1566_v56 }
 0x1c8   : > { %v553_v24 = vadd.f32 %v1370_v22, %v1933_v10  ;;  %v547_v25 = vpop.f32.mrb[5].mxu1  ;;  %1571 = vmatprep.subr.bf16.mxu0 %v1570_v58 }
 0x1c9   : > { %v548_v26 = vadd.f32 %v1933_v10, %v547_v25  ;;  %1421 = vmatprep.mubr.f32.mxu0 %v608_v21 }
 0x1ca   : > { %v611_v27 = vmax.f32 %v553_v24, 0.0  ;;  %1422 = vmatmul.mubr.f32.gmra.mrb[18].mxu0 %v609_v23 }
 0x1cb   : > { %v610_v28 = vmax.f32 %v548_v26, 0.0  ;;  %v1373_v29 = vpop.f32.mrb[6].mxu1  ;;  %1573 = vmatpush3.bf16.msra.mxu0 %v1570_v58 }
 0x1cc   : > { %v563_v30 = vadd.f32 %v1373_v29, %v1933_v10  ;;  %v557_v31 = vpop.f32.mrb[7].mxu1  ;;  %1575 = vmatprep.subr.bf16.mxu0 %v1574_v61 }
 0x1cd   : > { %v558_v32 = vadd.f32 %v1933_v10, %v557_v31  ;;  %1424 = vmatprep.mubr.f32.mxu0 %v610_v28 }
 0x1ce   : > { %v613_v33 = vmax.f32 %v563_v30, 0.0  ;;  %1425 = vmatmul.mubr.f32.gmra.mrb[20].mxu0 %v611_v27 }
 0x1cf   : > { %v612_v34 = vmax.f32 %v558_v32, 0.0  ;;  %v1376_v35 = vpop.f32.mrb[8].mxu1  ;;  %1577 = vmatpush3.bf16.msra.mxu0 %v1574_v61  ;;  %v1594_v61 = vpack.c.bf16 %v240_v60, %v239_v59 }
 0x1d0   : > { %v573_v36 = vadd.f32 %v1376_v35, %v1933_v10  ;;  %v567_v37 = vpop.f32.mrb[9].mxu1  ;;  %1579 = vmatprep.subr.bf16.mxu0 %v1896_v0 }
 0x1d1   : > { %v568_v38 = vadd.f32 %v1933_v10, %v567_v37  ;;  %1427 = vmatprep.mubr.f32.mxu0 %v612_v34  ;;  %1605 = vmatprep.subr.bf16.mxu1 %v1594_v61 }
 0x1d2   : > { %v615_v39 = vmax.f32 %v573_v36, 0.0  ;;  %1428 = vmatmul.mubr.f32.gmra.mrb[22].mxu0 %v613_v33  ;;  %1613 = vmatpush3.bf16.msra.mxu1 %v1594_v61 }
 0x1d3   : > { %v614_v40 = vmax.f32 %v568_v38, 0.0  ;;  %v1379_v41 = vpop.f32.mrb[10].mxu1  ;;  %1581 = vmatpush3.bf16.msra.mxu0 %v1896_v0 }
 0x1d4   : > { %v583_v42 = vadd.f32 %v1379_v41, %v1933_v10  ;;  %v577_v43 = vpop.f32.mrb[11].mxu1  ;;  %1583 = vmatprep.subr.bf16.mxu0 %v1905_v3 }
 0x1d5   : > { %v578_v44 = vadd.f32 %v1933_v10, %v577_v43  ;;  %1430 = vmatprep.mubr.f32.mxu0 %v614_v40 }
 0x1d6   : > { %v617_v45 = vmax.f32 %v583_v42, 0.0  ;;  %1431 = vmatmul.mubr.f32.gmra.mrb[24].mxu0 %v615_v39 }
 0x1d7   : > { %v616_v46 = vmax.f32 %v578_v44, 0.0  ;;  %v1382_v47 = vpop.f32.mrb[12].mxu1  ;;  %1585 = vmatpush3.bf16.msra.mxu0 %v1905_v3 }
 0x1d8   : > { %v593_v48 = vadd.f32 %v1382_v47, %v1933_v10  ;;  %v587_v49 = vpop.f32.mrb[13].mxu1  ;;  %1587 = vmatprep.subr.bf16.mxu0 %v1915_v6  ;;  %v1182_v47 = vld [vmem:[%s2095_s2 + $0x3] ss:$0 sm:$0xff] }
 0x1d9   : > { %v588_v50 = vadd.f32 %v1933_v10, %v587_v49  ;;  %1433 = vmatprep.mubr.f32.mxu0 %v616_v46 }
 0x1da   : > { %v619_v51 = vmax.f32 %v593_v48, 0.0  ;;  %1434 = vmatmul.mubr.f32.gmra.mrb[26].mxu0 %v617_v45 }
 0x1db   : > { %v618_v52 = vmax.f32 %v588_v50, 0.0  ;;  %v1385_v53 = vpop.f32.mrb[14].mxu1  ;;  %1589 = vmatpush3.bf16.msra.mxu0 %v1915_v6 }
 0x1dc   : > { %v603_v54 = vadd.f32 %v1385_v53, %v1933_v10  ;;  %v597_v55 = vpop.f32.mrb[15].mxu1  ;;  %1591 = vmatprep.subr.bf16.mxu0 %v1925_v9 }
 0x1dd   : > { %v598_v56 = vadd.f32 %v1933_v10, %v597_v55  ;;  %1436 = vmatprep.mubr.f32.mxu0 %v618_v52 }
 0x1de   : > { %v621_v57 = vmax.f32 %v603_v54, 0.0  ;;  %1437 = vmatmul.mubr.f32.gmra.mrb[28].mxu0 %v619_v51 }
 0x1df   : > { %v620_v58 = vmax.f32 %v598_v56, 0.0  ;;  %1593 = vmatpush3.bf16.msra.mxu0 %v1925_v9 }
 0x1e0   : > { %1595 = vmatprep.subr.bf16.mxu0 %v1594_v61 }
 0x1e1   : > { %1439 = vmatprep.mubr.f32.mxu0 %v620_v58 }
 0x1e2   : > { %1440 = vmatmul.mubr.f32.gmra.mrb[30].mxu0 %v621_v57 }
 0x1e3   : > { %1597 = vmatpush3.bf16.msra.mxu0 %v1594_v61 }
 0x299   : > { %v1420_v63 = vpop.f32.mrb[16].mxu0 }
 0x29a   : > { %v699_v0 = vadd.f32 %v1420_v63, %v1181_v62  ;;  %v693_v1 = vpop.f32.mrb[17].mxu0 }
 0x29b   : > { %v694_v2 = vadd.f32 %v1181_v62, %v693_v1 }
 0x29c   : > { %v773_v5 = vmax.f32 %v699_v0, 0.0 }
 0x29d   : > { %v772_v3 = vmax.f32 %v694_v2, 0.0  ;;  %v1423_v4 = vpop.f32.mrb[18].mxu0 }
 0x29e   : > { %v709_v6 = vadd.f32 %v1423_v4, %v1181_v62  ;;  %v703_v7 = vpop.f32.mrb[19].mxu0 }
 0x29f   : > { %v704_v8 = vadd.f32 %v1181_v62, %v703_v7  ;;  %1474 = vmatprep.mubr.f32.mxu0 %v772_v3 }
 0x2a0   : > { %1475 = vmatmul.mubr.f32.vlgmr.msra.gmra.mrb[32].mxu0 %v773_v5  ;;  %v775_v11 = vmax.f32 %v709_v6, 0.0 }
 0x2a1   : > { %v774_v9 = vmax.f32 %v704_v8, 0.0  ;;  %v1426_v10 = vpop.f32.mrb[20].mxu0 }
 0x2a2   : > { %v719_v12 = vadd.f32 %v1426_v10, %v1181_v62  ;;  %v713_v13 = vpop.f32.mrb[21].mxu0 }
 0x2a3   : > { %v714_v14 = vadd.f32 %v1181_v62, %v713_v13  ;;  %1477 = vmatprep.mubr.f32.mxu0 %v774_v9 }
 0x2a4   : > { %1478 = vmatmul.mubr.f32.gmra.mrb[34].mxu0 %v775_v11  ;;  %v777_v17 = vmax.f32 %v719_v12, 0.0 }
 0x2a5   : > { %v776_v15 = vmax.f32 %v714_v14, 0.0  ;;  %v1429_v16 = vpop.f32.mrb[22].mxu0 }
 0x2a6   : > { %v729_v18 = vadd.f32 %v1429_v16, %v1181_v62  ;;  %v723_v19 = vpop.f32.mrb[23].mxu0 }
 0x2a7   : > { %v724_v20 = vadd.f32 %v1181_v62, %v723_v19  ;;  %1480 = vmatprep.mubr.f32.mxu0 %v776_v15 }
 0x2a8   : > { %1481 = vmatmul.mubr.f32.gmra.mrb[36].mxu0 %v777_v17  ;;  %v779_v23 = vmax.f32 %v729_v18, 0.0 }
 0x2a9   : > { %v778_v21 = vmax.f32 %v724_v20, 0.0  ;;  %v1432_v22 = vpop.f32.mrb[24].mxu0 }
 0x2aa   : > { %v739_v24 = vadd.f32 %v1432_v22, %v1181_v62  ;;  %v733_v25 = vpop.f32.mrb[25].mxu0 }
 0x2ab   : > { %v734_v26 = vadd.f32 %v1181_v62, %v733_v25  ;;  %1483 = vmatprep.mubr.f32.mxu1 %v778_v21 }
 0x2ac   : > { %1484 = vmatmul.mubr.f32.vlgmr.msra.gmra.mrb[16].mxu1 %v779_v23  ;;  %v781_v29 = vmax.f32 %v739_v24, 0.0 }
 0x2ad   : > { %v780_v27 = vmax.f32 %v734_v26, 0.0  ;;  %v1435_v28 = vpop.f32.mrb[26].mxu0 }
 0x2ae   : > { %v749_v30 = vadd.f32 %v1435_v28, %v1181_v62  ;;  %v743_v31 = vpop.f32.mrb[27].mxu0 }
 0x2af   : > { %v744_v32 = vadd.f32 %v1181_v62, %v743_v31  ;;  %1486 = vmatprep.mubr.f32.mxu1 %v780_v27 }
 0x2b0   : > { %1487 = vmatmul.mubr.f32.gmra.mrb[18].mxu1 %v781_v29  ;;  %v783_v35 = vmax.f32 %v749_v30, 0.0 }
 0x2b1   : > { %v782_v33 = vmax.f32 %v744_v32, 0.0  ;;  %v1438_v34 = vpop.f32.mrb[28].mxu0 }
 0x2b2   : > { %v759_v36 = vadd.f32 %v1438_v34, %v1181_v62  ;;  %v753_v37 = vpop.f32.mrb[29].mxu0 }
 0x2b3   : > { %v754_v38 = vadd.f32 %v1181_v62, %v753_v37  ;;  %1489 = vmatprep.mubr.f32.mxu1 %v782_v33 }
 0x2b4   : > { %1490 = vmatmul.mubr.f32.gmra.mrb[20].mxu1 %v783_v35  ;;  %v785_v41 = vmax.f32 %v759_v36, 0.0 }
 0x2b5   : > { %v784_v39 = vmax.f32 %v754_v38, 0.0  ;;  %v1441_v40 = vpop.f32.mrb[30].mxu0 }
 0x2b6   : > { %v769_v42 = vadd.f32 %v1441_v40, %v1181_v62  ;;  %v763_v43 = vpop.f32.mrb[31].mxu0 }
 0x2b7   : > { %v764_v44 = vadd.f32 %v1181_v62, %v763_v43  ;;  %1492 = vmatprep.mubr.f32.mxu1 %v784_v39 }
 0x2b8   : > { %1493 = vmatmul.mubr.f32.gmra.mrb[22].mxu1 %v785_v41  ;;  %v787_v46 = vmax.f32 %v769_v42, 0.0 }
 0x2b9   : > { %v786_v45 = vmax.f32 %v764_v44, 0.0 }
 0x2bb   : > { %1495 = vmatprep.mubr.f32.mxu1 %v786_v45 }
 0x2bc   : > { %1496 = vmatmul.mubr.f32.gmra.mrb[24].mxu1 %v787_v46 }
 0x373   : > { %v1476_v48 = vpop.f32.mrb[32].mxu0 }
 0x374   : > { %v865_v49 = vadd.f32 %v1476_v48, %v1182_v47  ;;  %v859_v50 = vpop.f32.mrb[33].mxu0 }
 0x375   : > { %v860_v52 = vadd.f32 %v1182_v47, %v859_v50 }
 0x376   : > { %940 = vmax.xlane.f32.xlu0 %v865_v49 }
 0x377   : > { %v1479_v51 = vpop.f32.mrb[34].mxu0 }
 0x378   : > { %v875_v53 = vadd.f32 %v1479_v51, %v1182_v47  ;;  %v869_v54 = vpop.f32.mrb[35].mxu0 }
 0x379   : > { %v870_v56 = vadd.f32 %v1182_v47, %v869_v54 }
 0x37a   : > { %944 = vmax.xlane.f32.xlu1 %v875_v53  ;;  %938 = vmax.xlane.f32.xlu0 %v860_v52 }
 0x37b   : > { %v1482_v55 = vpop.f32.mrb[36].mxu0 }
 0x37c   : > { %v879_v57 = vpop.f32.mrb[37].mxu0  ;;  %v885_v60 = vadd.f32 %v1482_v55, %v1182_v47 }
 0x37d   : > { %v880_v58 = vadd.f32 %v1182_v47, %v879_v57 }
 0x37e   : > { %942 = vmax.xlane.f32.xlu1 %v870_v56 }
 0x37f   : > { %v1485_v59 = vpop.f32.mrb[16].mxu1  ;;  %946 = vmax.xlane.f32.xlu0 %v880_v58 }
 0x380   : > { %v889_v61 = vpop.f32.mrb[17].mxu1  ;;  %v895_v0 = vadd.f32 %v1485_v59, %v1182_v47 }
 0x381   : > { %v890_v62 = vadd.f32 %v1182_v47, %v889_v61 }
 0x382   : > { %948 = vmax.xlane.f32.xlu1 %v885_v60 }
 0x383   : > { %v1488_v63 = vpop.f32.mrb[18].mxu1  ;;  %950 = vmax.xlane.f32.xlu0 %v890_v62 }
 0x384   : > { %v899_v1 = vpop.f32.mrb[19].mxu1  ;;  %v1974_v4 = vadd.f32 %v1488_v63, %v1182_v47 }
 0x385   : > { %v1971_v2 = vadd.f32 %v1182_v47, %v899_v1 }
 0x386   : > { %952 = vmax.xlane.f32.xlu1 %v895_v0 }
 0x387   : > { %v1491_v3 = vpop.f32.mrb[20].mxu1  ;;  %954 = vmax.xlane.f32.xlu0 %v1971_v2 }
 0x388   : > { %v909_v5 = vpop.f32.mrb[21].mxu1  ;;  %v1980_v8 = vadd.f32 %v1491_v3, %v1182_v47 }
 0x389   : > { %v1976_v6 = vadd.f32 %v1182_v47, %v909_v5 }
 0x38a   : > { %956 = vmax.xlane.f32.xlu1 %v1974_v4 }
 0x38b   : > { %v1494_v7 = vpop.f32.mrb[22].mxu1  ;;  %958 = vmax.xlane.f32.xlu0 %v1976_v6 }
 0x38c   : > { %v919_v9 = vpop.f32.mrb[23].mxu1  ;;  %v1986_v12 = vadd.f32 %v1494_v7, %v1182_v47 }
 0x38d   : > { %v1982_v10 = vadd.f32 %v1182_v47, %v919_v9 }
 0x38e   : > { %960 = vmax.xlane.f32.xlu1 %v1980_v8 }
 0x38f   : > { %v1497_v11 = vpop.f32.mrb[24].mxu1  ;;  %962 = vmax.xlane.f32.xlu0 %v1982_v10 }
 0x390   : > { %v929_v13 = vpop.f32.mrb[25].mxu1  ;;  %v1992_v15 = vadd.f32 %v1497_v11, %v1182_v47 }
 0x391   : > { %v1988_v14 = vadd.f32 %v1182_v47, %v929_v13 }
 0x392   : > { %964 = vmax.xlane.f32.xlu1 %v1986_v12 }
 0x393   : > { %966 = vmax.xlane.f32.xlu0 %v1988_v14 }
 0x396   : > { %968 = vmax.xlane.f32.xlu1 %v1992_v15 }
 0x403   : > { %v941_v16 = vpop.xlane.xlu0 %940 }
 0x404   : > { %v971_v17 = vsub.f32 %v865_v49, %v941_v16 }
 0x406   : > { %v988_v18 = vmul.f32 1.442695, %v971_v17 }
 0x407   : > { %v945_v19 = vpop.xlane.xlu1 %944  ;;  %v939_v20 = vpop.xlane.xlu0 %938 }
 0x408   : > { %1622 = vpow2.f32 %v988_v18  ;;  %v973_v21 = vsub.f32 %v875_v53, %v945_v19  ;;  %v970_v22 = vsub.f32 %v860_v52, %v939_v20 }
 0x40a   : > { %v992_v23 = vmul.f32 1.442695, %v973_v21  ;;  %v986_v24 = vmul.f32 1.442695, %v970_v22 }
 0x40b   : > { %v943_v25 = vpop.xlane.xlu1 %942 }
 0x40c   : > { %1624 = vpow2.f32 %v992_v23  ;;  %v972_v26 = vsub.f32 %v870_v56, %v943_v25  ;;  %v947_v27 = vpop.xlane.xlu0 %946 }
 0x40d   : > { %1626 = vpow2.f32 %v986_v24  ;;  %v974_v28 = vsub.f32 %v880_v58, %v947_v27 }
 0x40e   : > { %v990_v29 = vmul.f32 1.442695, %v972_v26 }
 0x40f   : > { %v949_v30 = vpop.xlane.xlu1 %948  ;;  %v994_v33 = vmul.f32 1.442695, %v974_v28 }
 0x410   : > { %1628 = vpow2.f32 %v990_v29  ;;  %v975_v31 = vsub.f32 %v885_v60, %v949_v30  ;;  %v951_v32 = vpop.xlane.xlu0 %950 }
 0x411   : > { %v976_v34 = vsub.f32 %v890_v62, %v951_v32 }
 0x412   : > { %v1995_v35 = vpop.eup %1622  ;;  %v996_v36 = vmul.f32 1.442695, %v975_v31 }
 0x413   : > { %1020 = vadd.xlane.f32.xlu1 %v1995_v35  ;;  %v953_v37 = vpop.xlane.xlu1 %952  ;;  %v998_v40 = vmul.f32 1.442695, %v976_v34 }
 0x414   : > { %1630 = vpow2.f32 %v996_v36  ;;  %v977_v38 = vsub.f32 %v895_v0, %v953_v37  ;;  %v955_v39 = vpop.xlane.xlu0 %954 }
 0x415   : > { %1632 = vpow2.f32 %v994_v33  ;;  %v978_v41 = vsub.f32 %v1971_v2, %v955_v39 }
 0x416   : > { %v1999_v42 = vpop.eup %1624  ;;  %v1000_v43 = vmul.f32 1.442695, %v977_v38 }
 0x417   : > { %v2001_v44 = vpop.eup %1626  ;;  %1024 = vadd.xlane.f32.xlu1 %v1999_v42  ;;  %v957_v45 = vpop.xlane.xlu1 %956  ;;  %v1002_v48 = vmul.f32 1.442695, %v978_v41 }
 0x418   : > { %1634 = vpow2.f32 %v1000_v43  ;;  %v979_v46 = vsub.f32 %v1974_v4, %v957_v45  ;;  %1018 = vadd.xlane.f32.xlu0 %v2001_v44  ;;  %v959_v47 = vpop.xlane.xlu0 %958 }
 0x419   : > { %1636 = vpow2.f32 %v998_v40  ;;  %v980_v49 = vsub.f32 %v1976_v6, %v959_v47 }
 0x41a   : > { %v2007_v50 = vpop.eup %1628  ;;  %v1004_v51 = vmul.f32 1.442695, %v979_v46 }
 0x41b   : > { %v961_v52 = vpop.xlane.xlu1 %960  ;;  %v1006_v55 = vmul.f32 1.442695, %v980_v49 }
 0x41c   : > { %1638 = vpow2.f32 %v1004_v51  ;;  %v981_v53 = vsub.f32 %v1980_v8, %v961_v52  ;;  %1022 = vadd.xlane.f32.xlu0 %v2007_v50  ;;  %v963_v54 = vpop.xlane.xlu0 %962 }
 0x41d   : > { %1640 = vpow2.f32 %v1002_v48  ;;  %v982_v56 = vsub.f32 %v1982_v10, %v963_v54 }
 0x41e   : > { %v2012_v57 = vpop.eup %1630  ;;  %v1008_v58 = vmul.f32 1.442695, %v981_v53 }
 0x41f   : > { %v2014_v59 = vpop.eup %1632  ;;  %1028 = vadd.xlane.f32.xlu1 %v2012_v57  ;;  %v965_v60 = vpop.xlane.xlu1 %964  ;;  %v1010_v63 = vmul.f32 1.442695, %v982_v56 }
 0x420   : > { %1642 = vpow2.f32 %v1008_v58  ;;  %v983_v61 = vsub.f32 %v1986_v12, %v965_v60  ;;  %1026 = vadd.xlane.f32.xlu0 %v2014_v59  ;;  %v967_v62 = vpop.xlane.xlu0 %966 }
 0x421   : > { %1644 = vpow2.f32 %v1006_v55  ;;  %v984_v0 = vsub.f32 %v1988_v14, %v967_v62 }
 0x422   : > { %v2020_v1 = vpop.eup %1634  ;;  %v1012_v2 = vmul.f32 1.442695, %v983_v61 }
 0x423   : > { %v2022_v3 = vpop.eup %1636  ;;  %1032 = vadd.xlane.f32.xlu1 %v2020_v1  ;;  %v969_v4 = vpop.xlane.xlu1 %968  ;;  %v1014_v6 = vmul.f32 1.442695, %v984_v0 }
 0x424   : > { %1646 = vpow2.f32 %v1012_v2  ;;  %v985_v5 = vsub.f32 %v1992_v15, %v969_v4  ;;  %1030 = vadd.xlane.f32.xlu0 %v2022_v3 }
 0x425   : > { %1648 = vpow2.f32 %v1010_v63 }
 0x426   : > { %v2027_v7 = vpop.eup %1638  ;;  %v1016_v8 = vmul.f32 1.442695, %v985_v5 }
 0x427   : > { %v2029_v9 = vpop.eup %1640  ;;  %1036 = vadd.xlane.f32.xlu1 %v2027_v7 }
 0x428   : > { %1650 = vpow2.f32 %v1016_v8  ;;  %1034 = vadd.xlane.f32.xlu0 %v2029_v9 }
 0x429   : > { %1652 = vpow2.f32 %v1014_v6 }
 0x42a   : > { %v2033_v10 = vpop.eup %1642 }
 0x42b   : > { %v2035_v11 = vpop.eup %1644  ;;  %1040 = vadd.xlane.f32.xlu1 %v2033_v10 }
 0x42c   : > { %1038 = vadd.xlane.f32.xlu0 %v2035_v11 }
 0x42e   : > { %v2039_v12 = vpop.eup %1646 }
 0x42f   : > { %v2041_v13 = vpop.eup %1648  ;;  %1044 = vadd.xlane.f32.xlu1 %v2039_v12 }
 0x430   : > { %1042 = vadd.xlane.f32.xlu0 %v2041_v13 }
 0x432   : > { %v2045_v14 = vpop.eup %1650 }
 0x433   : > { %v2047_v15 = vpop.eup %1652  ;;  %1048 = vadd.xlane.f32.xlu1 %v2045_v14 }
 0x434   : > { %1046 = vadd.xlane.f32.xlu0 %v2047_v15 }
 0x4a0   : > { %v1021_v16 = vpop.xlane.xlu1 %1020 }
 0x4a1   : > { %1654 = vrcp.f32 %v1021_v16 }
 0x4a4   : > { %v1025_v17 = vpop.xlane.xlu1 %1024 }
 0x4a5   : > { %1656 = vrcp.f32 %v1025_v17  ;;  %v1019_v18 = vpop.xlane.xlu0 %1018 }
 0x4a6   : > { %1658 = vrcp.f32 %v1019_v18 }
 0x4a9   : > { %v1023_v19 = vpop.xlane.xlu0 %1022 }
 0x4aa   : > { %1660 = vrcp.f32 %v1023_v19 }
 0x4ab   : > { %v1655_v20 = vpop.eup %1654 }
 0x4ac   : > { %v1067_v21 = vmul.f32 %v1655_v20, %v1995_v35  ;;  %v1029_v22 = vpop.xlane.xlu1 %1028 }
 0x4ad   : > { %1662 = vrcp.f32 %v1029_v22  ;;  %v1027_v23 = vpop.xlane.xlu0 %1026 }
 0x4ae   : > { %1083 = vst [vmem:[%s2056_s8 + $0x8] sm:$0xff] %v1067_v21  ;;  %1664 = vrcp.f32 %v1027_v23 }
 0x4af   : > { %v1657_v24 = vpop.eup %1656 }
 0x4b0   : > { %v1659_v25 = vpop.eup %1658  ;;  %v1069_v26 = vmul.f32 %v1657_v24, %v1999_v42  ;;  %v1033_v27 = vpop.xlane.xlu1 %1032 }
 0x4b1   : > { %v1066_v28 = vmul.f32 %v1659_v25, %v2001_v44  ;;  %1666 = vrcp.f32 %v1033_v27  ;;  %v1031_v29 = vpop.xlane.xlu0 %1030 }
 0x4b2   : > { %1085 = vst [vmem:[%s2056_s8 + $0x18] sm:$0xff] %v1069_v26  ;;  %1668 = vrcp.f32 %v1031_v29 }
 0x4b3   : > { %1082 = vst [vmem:[%s2056_s8] sm:$0xff] %v1066_v28 }
 0x4b4   : > { %v1661_v30 = vpop.eup %1660  ;;  %v1037_v31 = vpop.xlane.xlu1 %1036 }
 0x4b5   : > { %v1068_v32 = vmul.f32 %v1661_v30, %v2007_v50  ;;  %1670 = vrcp.f32 %v1037_v31  ;;  %v1035_v33 = vpop.xlane.xlu0 %1034 }
 0x4b6   : > { %1672 = vrcp.f32 %v1035_v33 }
 0x4b7   : > { %v1663_v34 = vpop.eup %1662  ;;  %1084 = vst [vmem:[%s2056_s8 + $0x10] sm:$0xff] %v1068_v32 }
 0x4b8   : > { %v1665_v35 = vpop.eup %1664  ;;  %v1071_v36 = vmul.f32 %v1663_v34, %v2012_v57  ;;  %v1041_v37 = vpop.xlane.xlu1 %1040 }
 0x4b9   : > { %v1070_v38 = vmul.f32 %v1665_v35, %v2014_v59  ;;  %1674 = vrcp.f32 %v1041_v37  ;;  %v1039_v39 = vpop.xlane.xlu0 %1038 }
 0x4ba   : > { %1087 = vst [vmem:[%s2056_s8 + $0x28] sm:$0xff] %v1071_v36  ;;  %1676 = vrcp.f32 %v1039_v39 }
 0x4bb   : > { %v1667_v40 = vpop.eup %1666  ;;  %1086 = vst [vmem:[%s2056_s8 + $0x20] sm:$0xff] %v1070_v38 }
 0x4bc   : > { %v1669_v41 = vpop.eup %1668  ;;  %v1073_v42 = vmul.f32 %v1667_v40, %v2020_v1  ;;  %v1045_v43 = vpop.xlane.xlu1 %1044 }
 0x4bd   : > { %v1072_v44 = vmul.f32 %v1669_v41, %v2022_v3  ;;  %1678 = vrcp.f32 %v1045_v43  ;;  %v1043_v45 = vpop.xlane.xlu0 %1042 }
 0x4be   : > { %1089 = vst [vmem:[%s2056_s8 + $0x38] sm:$0xff] %v1073_v42  ;;  %1680 = vrcp.f32 %v1043_v45 }
 0x4bf   : > { %v1671_v46 = vpop.eup %1670  ;;  %1088 = vst [vmem:[%s2056_s8 + $0x30] sm:$0xff] %v1072_v44 }
 0x4c0   : > { %v1673_v47 = vpop.eup %1672  ;;  %v1075_v48 = vmul.f32 %v1671_v46, %v2027_v7  ;;  %v1049_v49 = vpop.xlane.xlu1 %1048 }
 0x4c1   : > { %v1074_v50 = vmul.f32 %v1673_v47, %v2029_v9  ;;  %1682 = vrcp.f32 %v1049_v49  ;;  %v1047_v51 = vpop.xlane.xlu0 %1046 }
 0x4c2   : > { %1091 = vst [vmem:[%s2056_s8 + $0x48] sm:$0xff] %v1075_v48  ;;  %1684 = vrcp.f32 %v1047_v51 }
 0x4c3   : > { %v1675_v52 = vpop.eup %1674  ;;  %1090 = vst [vmem:[%s2056_s8 + $0x40] sm:$0xff] %v1074_v50 }
 0x4c4   : > { %v1677_v53 = vpop.eup %1676  ;;  %v1077_v54 = vmul.f32 %v1675_v52, %v2033_v10 }
 0x4c5   : > { %v1076_v55 = vmul.f32 %v1677_v53, %v2035_v11 }
 0x4c6   : > { %1093 = vst [vmem:[%s2056_s8 + $0x58] sm:$0xff] %v1077_v54 }
 0x4c7   : > { %v1679_v56 = vpop.eup %1678  ;;  %1092 = vst [vmem:[%s2056_s8 + $0x50] sm:$0xff] %v1076_v55 }
 0x4c8   : > { %v1681_v57 = vpop.eup %1680  ;;  %v1079_v58 = vmul.f32 %v1679_v56, %v2039_v12 }
 0x4c9   : > { %v1078_v59 = vmul.f32 %v1681_v57, %v2041_v13 }
 0x4ca   : > { %1095 = vst [vmem:[%s2056_s8 + $0x68] sm:$0xff] %v1079_v58 }
 0x4cb   : > { %v1683_v60 = vpop.eup %1682  ;;  %1094 = vst [vmem:[%s2056_s8 + $0x60] sm:$0xff] %v1078_v59 }
 0x4cc   : > { %v1685_v61 = vpop.eup %1684  ;;  %v1081_v62 = vmul.f32 %v1683_v60, %v2045_v14 }
 0x4cd   : > { %v1080_v63 = vmul.f32 %v1685_v61, %v2047_v15 }
 0x4ce   : > { %1097 = vst [vmem:[%s2056_s8 + $0x78] sm:$0xff] %v1081_v62 }
 0x4cf   : > { %1096 = vst [vmem:[%s2056_s8 + $0x70] sm:$0xff] %v1080_v63 }
 0x4d0 PF: > { %s13_s12 = sadd.s32 1, %s1692_s12  }
 0x4d1   : > { %p10_p4 = scmp.ge.s32.totalorder %s13_s12, 6  }
 0x4d3   :  { %12 = sbr.rel (!%p10_p4) target bundleno = 1 (0x1), region = 62 }

</bundles_post_ra>
